<compile_context>
chip_gen: v5e
topology: v5e:2x2
jax: 0.10.0
libtpu: 0.0.40
codegen_flags: <defaults>
</compile_context>

<pallas_src>
import functools

import jax
import jax.numpy as jnp
import numpy as np
from jax.experimental import pallas as pl
from jax.experimental.pallas import tpu as pltpu


def channel_gate_kernel(x_ref, w1t_ref, b1_ref, w2_ref, b2_ref, o_ref, *, inv_hw):
    """Fused ChannelGate for one batch element.

    x_ref  : (1, C, HW)  input block (lane-dense trailing dim)
    w1t_ref: (C, Ch)     first Linear weight, pre-transposed (W1.T)
    b1_ref : (1, Ch)     first Linear bias
    w2_ref : (C, Ch)     second Linear weight (PyTorch layout (out=C, in=Ch))
    b2_ref : (C, 1)      second Linear bias
    o_ref  : (1, C, HW)  output block
    """
    xb = x_ref[0]                                            # (C, HW) f32

    # Global spatial pooling per channel: lane-axis reductions.
    avg = jnp.sum(xb, axis=1, keepdims=True) * inv_hw        # (C, 1)
    mx = jnp.max(xb, axis=1, keepdims=True)                  # (C, 1)

    w1t = w1t_ref[...]                                       # (C, Ch)
    b1 = b1_ref[...]                                         # (1, Ch)
    w2 = w2_ref[...]                                         # (C, Ch)
    b2 = b2_ref[...]                                         # (C, 1)

    def mlp(p_col):                                          # p_col: (C, 1)
        # h[j] = sum_c W1[j, c] * p[c] + b1[j]
        h = jnp.sum(w1t * p_col, axis=0, keepdims=True) + b1     # (1, Ch)
        h = jnp.maximum(h, 0.0)                                  # ReLU
        # o[c] = sum_j W2[c, j] * h[j] + b2[c]
        return jnp.sum(w2 * h, axis=1, keepdims=True) + b2       # (C, 1)

    att = mlp(avg) + mlp(mx)                                 # (C, 1)
    scale = jax.nn.sigmoid(att)                              # (C, 1)

    o_ref[0] = xb * scale                                    # broadcast over HW lanes


def channel_gate(x, w1, b1, w2, b2):
    """x: (B, C, H, W) f32; w1: (Ch, C); b1: (Ch,); w2: (C, Ch); b2: (C,)."""
    B, C, H, W = x.shape
    HW = H * W
    Ch = w1.shape[0]

    x_flat = x.reshape(B, C, HW).astype(jnp.float32)
    w1t = jnp.asarray(w1, jnp.float32).T                     # (C, Ch)
    b1r = jnp.asarray(b1, jnp.float32).reshape(1, Ch)
    w2m = jnp.asarray(w2, jnp.float32)                       # (C, Ch)
    b2c = jnp.asarray(b2, jnp.float32).reshape(C, 1)

    out_flat = pl.pallas_call(
        functools.partial(channel_gate_kernel, inv_hw=1.0 / float(HW)),
        out_shape=jax.ShapeDtypeStruct((B, C, HW), jnp.float32),
        grid=(B,),
        in_specs=[
            pl.BlockSpec((1, C, HW), lambda b: (b, 0, 0)),   # x[b]
            pl.BlockSpec((C, Ch), lambda b: (0, 0)),         # W1.T (full array)
            pl.BlockSpec((1, Ch), lambda b: (0, 0)),         # b1
            pl.BlockSpec((C, Ch), lambda b: (0, 0)),         # W2
            pl.BlockSpec((C, 1), lambda b: (0, 0)),          # b2
        ],
        out_specs=pl.BlockSpec((1, C, HW), lambda b: (b, 0, 0)),
        compiler_params=pltpu.CompilerParams(
            dimension_semantics=("parallel",),               # independent per-batch work
        ),
    )(x_flat, w1t, b1r, w2m, b2c)

    return out_flat.reshape(B, C, H, W).astype(x.dtype)


if __name__ == "__main__":
    # Small shapes consistent with the module: gate_channels=32, reduction_ratio=16.
    B, C, H, W = 2, 32, 16, 16
    R = 16
    Ch = C // R                                              # hidden width = 2

    key = jax.random.PRNGKey(0)
    kx, k1, kb1, k2, kb2 = jax.random.split(key, 5)
    x = jax.random.normal(kx, (B, C, H, W), dtype=jnp.float32)
    w1 = jax.random.normal(k1, (Ch, C), dtype=jnp.float32) * 0.1   # Linear(C, Ch).weight
    b1 = jax.random.normal(kb1, (Ch,), dtype=jnp.float32) * 0.1
    w2 = jax.random.normal(k2, (C, Ch), dtype=jnp.float32) * 0.1   # Linear(Ch, C).weight
    b2 = jax.random.normal(kb2, (C,), dtype=jnp.float32) * 0.1

    out = jax.block_until_ready(channel_gate(x, w1, b1, w2, b2))

    # Pure-JAX reference (matches the PyTorch forward).
    avg_pool = jnp.mean(x, axis=(2, 3))                      # (B, C)
    max_pool = jnp.max(x, axis=(2, 3))                       # (B, C)

    def mlp_ref(p):
        h = jnp.maximum(p @ w1.T + b1, 0.0)
        return h @ w2.T + b2

    att = mlp_ref(avg_pool) + mlp_ref(max_pool)
    ref = x * jax.nn.sigmoid(att)[:, :, None, None]

    np.testing.assert_allclose(np.asarray(out), np.asarray(ref), rtol=1e-5, atol=1e-5)
    print("KERNEL_OK")
</pallas_src>

<mosaic_0001>
module attributes {stable_mosaic.version = 11 : i64} {
  func.func @channel_gate_kernel(%arg0: i32, %arg1: memref<1x32x256xf32, #tpu.memory_space<vmem>>, %arg2: memref<32x2xf32, #tpu.memory_space<vmem>>, %arg3: memref<1x2xf32, #tpu.memory_space<vmem>>, %arg4: memref<32x2xf32, #tpu.memory_space<vmem>>, %arg5: memref<32x1xf32, #tpu.memory_space<vmem>>, %arg6: memref<1x32x256xf32, #tpu.memory_space<vmem>>) attributes {dimension_semantics = [#tpu.dimension_semantics<parallel>], iteration_bounds = array<i64: 2>, scalar_prefetch = 0 : i64, scratch_operands = 0 : i64, tpu.core_type = #tpu.core_type<tc>, window_params = [{transform_indices = @transform_0, window_bounds = array<i64: 1, 32, 256>}, {pipeline_mode = #tpu.pipeline_mode<synchronous>, transform_indices = @transform_1, window_bounds = array<i64: 32, 2>}, {pipeline_mode = #tpu.pipeline_mode<synchronous>, transform_indices = @transform_2, window_bounds = array<i64: 1, 2>}, {pipeline_mode = #tpu.pipeline_mode<synchronous>, transform_indices = @transform_3, window_bounds = array<i64: 32, 2>}, {pipeline_mode = #tpu.pipeline_mode<synchronous>, transform_indices = @transform_4, window_bounds = array<i64: 32, 1>}, {transform_indices = @transform_5, window_bounds = array<i64: 1, 32, 256>}]} {
    %c0 = arith.constant 0 : index
    %c0_0 = arith.constant 0 : index
    %c0_1 = arith.constant 0 : index
    %0 = vector.load %arg1[%c0, %c0_0, %c0_1] : memref<1x32x256xf32, #tpu.memory_space<vmem>>, vector<1x32x256xf32>
    %1 = vector.shape_cast %0 : vector<1x32x256xf32> to vector<32x256xf32>
    %cst = arith.constant dense<0.000000e+00> : vector<32xf32>
    %2 = vector.multi_reduction <add>, %1, %cst [1] : vector<32x256xf32> to vector<32xf32>
    %3 = vector.shape_cast %2 : vector<32xf32> to vector<32x1xf32>
    %cst_2 = arith.constant 3.906250e-03 : f32
    %4 = vector.broadcast %cst_2 : f32 to vector<32x1xf32>
    %5 = arith.mulf %3, %4 : vector<32x1xf32>
    %cst_3 = arith.constant dense<0xFF800000> : vector<32xf32>
    %6 = vector.multi_reduction <maximumf>, %1, %cst_3 [1] : vector<32x256xf32> to vector<32xf32>
    %7 = vector.shape_cast %6 : vector<32xf32> to vector<32x1xf32>
    %c0_4 = arith.constant 0 : index
    %c0_5 = arith.constant 0 : index
    %8 = vector.load %arg2[%c0_4, %c0_5] : memref<32x2xf32, #tpu.memory_space<vmem>>, vector<32x2xf32>
    %c0_6 = arith.constant 0 : index
    %c0_7 = arith.constant 0 : index
    %9 = vector.load %arg3[%c0_6, %c0_7] : memref<1x2xf32, #tpu.memory_space<vmem>>, vector<1x2xf32>
    %c0_8 = arith.constant 0 : index
    %c0_9 = arith.constant 0 : index
    %10 = vector.load %arg4[%c0_8, %c0_9] : memref<32x2xf32, #tpu.memory_space<vmem>>, vector<32x2xf32>
    %c0_10 = arith.constant 0 : index
    %c0_11 = arith.constant 0 : index
    %11 = vector.load %arg5[%c0_10, %c0_11] : memref<32x1xf32, #tpu.memory_space<vmem>>, vector<32x1xf32>
    %12 = vector.broadcast %5 : vector<32x1xf32> to vector<32x2xf32>
    %13 = arith.mulf %8, %12 : vector<32x2xf32>
    %cst_12 = arith.constant dense<0.000000e+00> : vector<2xf32>
    %14 = vector.multi_reduction <add>, %13, %cst_12 [0] : vector<32x2xf32> to vector<2xf32>
    %15 = vector.shape_cast %14 : vector<2xf32> to vector<1x2xf32>
    %16 = arith.addf %15, %9 : vector<1x2xf32>
    %cst_13 = arith.constant 0.000000e+00 : f32
    %17 = vector.broadcast %cst_13 : f32 to vector<1x2xf32>
    %18 = arith.maximumf %16, %17 : vector<1x2xf32>
    %19 = vector.broadcast %18 : vector<1x2xf32> to vector<32x2xf32>
    %20 = arith.mulf %10, %19 : vector<32x2xf32>
    %cst_14 = arith.constant dense<0.000000e+00> : vector<32xf32>
    %21 = vector.multi_reduction <add>, %20, %cst_14 [1] : vector<32x2xf32> to vector<32xf32>
    %22 = vector.shape_cast %21 : vector<32xf32> to vector<32x1xf32>
    %23 = arith.addf %22, %11 : vector<32x1xf32>
    %24 = vector.broadcast %7 : vector<32x1xf32> to vector<32x2xf32>
    %25 = arith.mulf %8, %24 : vector<32x2xf32>
    %cst_15 = arith.constant dense<0.000000e+00> : vector<2xf32>
    %26 = vector.multi_reduction <add>, %25, %cst_15 [0] : vector<32x2xf32> to vector<2xf32>
    %27 = vector.shape_cast %26 : vector<2xf32> to vector<1x2xf32>
    %28 = arith.addf %27, %9 : vector<1x2xf32>
    %cst_16 = arith.constant 0.000000e+00 : f32
    %29 = vector.broadcast %cst_16 : f32 to vector<1x2xf32>
    %30 = arith.maximumf %28, %29 : vector<1x2xf32>
    %31 = vector.broadcast %30 : vector<1x2xf32> to vector<32x2xf32>
    %32 = arith.mulf %10, %31 : vector<32x2xf32>
    %cst_17 = arith.constant dense<0.000000e+00> : vector<32xf32>
    %33 = vector.multi_reduction <add>, %32, %cst_17 [1] : vector<32x2xf32> to vector<32xf32>
    %34 = vector.shape_cast %33 : vector<32xf32> to vector<32x1xf32>
    %35 = arith.addf %34, %11 : vector<32x1xf32>
    %36 = arith.addf %23, %35 : vector<32x1xf32>
    %37 = arith.negf %36 : vector<32x1xf32>
    %38 = math.exp %37 : vector<32x1xf32>
    %cst_18 = arith.constant 1.000000e+00 : f32
    %39 = vector.broadcast %cst_18 : f32 to vector<32x1xf32>
    %40 = arith.addf %39, %38 : vector<32x1xf32>
    %41 = arith.divf %39, %40 : vector<32x1xf32>
    %42 = vector.broadcast %41 : vector<32x1xf32> to vector<32x256xf32>
    %43 = arith.mulf %1, %42 : vector<32x256xf32>
    %c0_19 = arith.constant 0 : index
    %c0_20 = arith.constant 0 : index
    %c0_21 = arith.constant 0 : index
    %44 = vector.load %arg6[%c0_19, %c0_20, %c0_21] : memref<1x32x256xf32, #tpu.memory_space<vmem>>, vector<1x32x256xf32>
    %45 = vector.shape_cast %44 : vector<1x32x256xf32> to vector<32x256xf32>
    %46 = vector.shape_cast %43 : vector<32x256xf32> to vector<1x32x256xf32>
    tpu.vector_store %arg6[%c0_19, %c0_20, %c0_21], %46 {strides = array<i32>} : memref<1x32x256xf32, #tpu.memory_space<vmem>>, vector<1x32x256xf32>,
    return
  }
  func.func @transform_0(%arg0: i32) -> (i32, i32, i32) {
    %c0_i32 = arith.constant 0 : i32
    %c0_i32_0 = arith.constant 0 : i32
    %c0_i32_1 = arith.constant 0 : i32
    return %arg0, %c0_i32, %c0_i32_0 : i32, i32, i32
  }
  func.func @transform_1(%arg0: i32) -> (i32, i32) {
    %c0_i32 = arith.constant 0 : i32
    %c0_i32_0 = arith.constant 0 : i32
    %c0_i32_1 = arith.constant 0 : i32
    return %c0_i32, %c0_i32_0 : i32, i32
  }
  func.func @transform_2(%arg0: i32) -> (i32, i32) {
    %c0_i32 = arith.constant 0 : i32
    %c0_i32_0 = arith.constant 0 : i32
    %c0_i32_1 = arith.constant 0 : i32
    return %c0_i32, %c0_i32_0 : i32, i32
  }
  func.func @transform_3(%arg0: i32) -> (i32, i32) {
    %c0_i32 = arith.constant 0 : i32
    %c0_i32_0 = arith.constant 0 : i32
    %c0_i32_1 = arith.constant 0 : i32
    return %c0_i32, %c0_i32_0 : i32, i32
  }
  func.func @transform_4(%arg0: i32) -> (i32, i32) {
    %c0_i32 = arith.constant 0 : i32
    %c0_i32_0 = arith.constant 0 : i32
    %c0_i32_1 = arith.constant 0 : i32
    return %c0_i32, %c0_i32_0 : i32, i32
  }
  func.func @transform_5(%arg0: i32) -> (i32, i32, i32) {
    %c0_i32 = arith.constant 0 : i32
    %c0_i32_0 = arith.constant 0 : i32
    %c0_i32_1 = arith.constant 0 : i32
    return %arg0, %c0_i32, %c0_i32_0 : i32, i32, i32
  }
}

</mosaic_0001>

<bundles_post_ra>
// kernel: tpu_custom_call.1
= control target key start
LH: loop header
LB: loop body
LE: loop exit
PB: predicated region body
PF: predicated region fallthrough
CT: control target
= control target key end

     0   :  { %10 = vsyncpa [#allocation3], 0  ;;  %s1029_s0 = inlined_call_operand.hbm [shape: f32[2,32,256], index: 0, kind: input, shape index: {}]   ;;  %s1030_s1 = inlined_call_operand.vmem [shape: f32[32,2], index: 1, kind: input, shape index: {}]   ;;  %s1031_s2 = inlined_call_operand.vmem [shape: f32[1,2], index: 2, kind: input, shape index: {}]   ;;  %s1032_s3 = inlined_call_operand.vmem [shape: f32[32,2], index: 3, kind: input, shape index: {}]   ;;  %s1033_s4 = inlined_call_operand.vmem [shape: f32[32,1], index: 4, kind: input, shape index: {}]   ;;  %s1034_s5 = inlined_call_operand.hbm [shape: f32[2,32,256], index: 5, kind: output, shape index: {}]  }
   0x1   :  { %12 = vsyncpa [#allocation3 + $0x1], 0 }
   0x2   :  { %13 = vsyncpa [#allocation4], 0 }
   0x3   :  { %15 = vsyncpa [#allocation4 + $0x1], 0  ;;  %s803_s18 = smov 0   ;;  %s805_s19 = smov 0  }
   0x4   :  { %s807_s20 = smov 0   ;;  %s809_s21 = smov 0  }
   0x5 LB: > { %s824_s22 = sadd.s32 4294967295, %s766_s21   ;;  %s580_s23 = sadd.s32 4294967294, %s766_s21   ;;  %s766_s21 = sphi %s809_s21, %s1044_s21   ;;  %s762_s20 = sphi %s807_s20, %s1043_s20   ;;  %s758_s19 = sphi %s805_s19, %s1042_s19   ;;  %s754_s18 = sphi %s803_s18, %s1041_s18  }
   0x6   : > { %s828_s24 = sadd.s32 1, %s766_s21   ;;  %s28_s25 = sadd.s32 1, %s762_s20 }
   0x7   : > { %s25_s26 = ssub.s32 %s766_s21, %s828_s24  ;;  %p35_p0 = scmp.ne.s32.totalorder %s762_s20, %s758_s19 }
   0x8   : > { %p26_p1 = scmp.eq.s32.totalorder %s25_s26, 0  ;;  %p36_p2 = scmp.eq.s32.totalorder %s766_s21, 0 }
   0x9   : > { %p41_p3 = scmp.ne.s32.totalorder %s758_s19, %s754_s18  ;;  %p42_p4 = scmp.eq.s32.totalorder %s824_s22, 0 }
   0xa   : > { %s840_s27 = scalar_select %p26_p1, %s762_s20, %s28_s25  }
   0xb   : > { %p842_p5 = por %p36_p2, %p35_p0  ;;  %p846_p6 = por %p42_p4, %p41_p3 }
   0xc   : > { %p149_p7 = scmp.eq.s32.totalorder %s824_s22, 1  ;;  %p155_p8 = scmp.eq.s32.totalorder %s580_s23, 1 }
   0xd   : > { %p612_p10 = scmp.lt.s32.totalorder %s766_s21, 2  ;;  %s187_s7 = sand.u32 1, %s762_s20  }
   0xe   : > { %p853_p11 = por %p149_p7, %p35_p0  ;;  %p857_p12 = por %p155_p8, %p41_p3 }
   0xf   : > { %s598_s8 = sshll.u32 %s766_s21, 6  ;;  %s583_s9 = sshll.u32 %s187_s7, 6 }
  0x10   : > { %s196_s12 = scalar_lea.hbm %s1029_s0, %s598_s8  ;;  %s191_s14 = scalar_lea.vmem [#allocation2], %s583_s9 }
  0x11   : > { %s197_s13 = sshll.u32 %s196_s12, 4  ;;  %s199_s15 = sshll.u32 %s191_s14, 4  ;;  %s198_s13 = int_to_ptr.hbm [resolvable:$true] %s197_s13  ;;  %s200_s15 = int_to_ptr.vmem [resolvable:$true] %s199_s15 }
  0x12   : > { %p868_p13 = pnand %p612_p10, %p842_p5  ;;  %p586_p0 = scmp.ge.s32.totalorder %s766_s21, 1 }
  0x13   : > { %p207_p1 = scmp.lt.s32.totalorder %s766_s21, 3  ;;  %s188_s17 = scalar_lea.sflag [#allocation3], %s187_s7 }
  0x14   : > { %s670_s23 = sshra.s32 %s198_s13, 4  ;;  %p674_p3 = pneg %p868_p13  ;;  %s671_s23 = int_to_ptr.hbm [resolvable:$true] %s670_s23 }
  0x15   : > { %s672_s25 = scalar_lea.hbm %s671_s23, 64  ;;  %s677_s28 = scalar_lea.hbm %s1029_s0, 128 }
  0x16   : > { %p673_p2 = scmp.ne.s32.totalorder %s671_s23, %s672_s25  ;;  %p678_p5 = scmp.lt.s32.totalorder %s671_s23, %s1029_s0 }
  0x17   : > { %p679_p8 = scmp.lt.s32.totalorder %s677_s28, %s672_s25 }
  0x18   : > { %p675_p4 = pnand %p674_p3, %p673_p2 }
  0x19   : > { %p680_p10 = por %p679_p8, %p678_p5 }
  0x1a   : > { %p676_p7 = pneg %p675_p4 }
  0x1c   : > { %p681_p9 = pnand %p680_p10, %p676_p7 }
  0x1e   : > { %684 = shalt.err (!%p681_p9)
}
  0x1f   : > { %s768_s7 = smov 256   ;;  %s769_s11 = smov 16  }
  0x20   : > { %607 = dma.hbm_to_vmem [thread:$0]  (!%p868_p13), %s198_s13, 1024, %s200_s15, %s188_s17, %s768_s7, %s768_s7, %s769_s11  }
  0x21   : > { %p208_p2 = pnand %p586_p0, %p207_p1 }
  0x22   : > { %s889_s12 = sand.u32 (!%p208_p2), 1, %s758_s19  }
  0x23   : > { %211 = sbr.rel (%p208_p2) target bundleno = 487 (0x1e7), region = 40  ;;  %s587_s14 = sshll.u32 (!%p208_p2), %s889_s12, 6 }
  0x24   : > { %s214_s23 = scalar_lea.sflag (!%p208_p2), [#allocation3], %s889_s12  ;;  %s217_s25 = scalar_lea.vmem (!%p208_p2), [#allocation2], %s587_s14 }
  0x28   : > { %745 = dma.done.wait (%p846_p6), %s214_s23, 1024  }
  0x29   : > { %747 = vsyncadd (%p846_p6), %s214_s23, 4294966272  ;;  %v899_v0 = vld [vmem:[%s217_s25 + $0x20] sm:$0xff]  ;;  %v901_v1 = vld [vmem:[%s217_s25 + $0x28] sm:$0xff]  ;;  %vm298_vm0 = vcmask 15360   ;;  %s244_s23 = scalar_lea.vmem [#allocation5], %s587_s14  ;;  %s492_s17 = scalar_lea.sflag [#allocation4], %s889_s12 }
  0x2a   : > { %v903_v2 = vld [vmem:[%s217_s25] sm:$0xff]  ;;  %v259_v3 = vadd.f32 %v901_v1, %v899_v0  ;;  %v907_v4 = vld [vmem:[%s217_s25 + $0x8] sm:$0xff]  ;;  %v909_v5 = vld [vmem:[%s217_s25 + $0x10] sm:$0xff]  ;;  %v275_v15 = vmax.f32 %v899_v0, %v901_v1  ;;  %s504_s15 = sshll.u32 %s244_s23, 4  ;;  %s720_s9 = scalar_lea.hbm %s1034_s5, 128  ;;  %s505_s15 = int_to_ptr.vmem [resolvable:$true] %s504_s15 }
  0x2b   : > { %v911_v6 = vld [vmem:[%s217_s25 + $0x18] sm:$0xff]  ;;  %v253_v7 = vadd.f32 %v907_v4, %v903_v2  ;;  %v917_v9 = vld [vmem:[%s217_s25 + $0x30] sm:$0xff]  ;;  %v269_v11 = vmax.f32 %v903_v2, %v907_v4  ;;  %v281_v21 = vld [vmem:[%s1030_s1] sm:$0xff] }
  0x2c   : > { %v272_v8 = vmax.f32 %v909_v5, %v911_v6  ;;  %260 = vadd.xlane.f32.xlu1 %v259_v3  ;;  %v919_v10 = vld [vmem:[%s217_s25 + $0x38] sm:$0xff]  ;;  %v256_v12 = vadd.f32 %v911_v6, %v909_v5  ;;  %v283_v22 = vld [vmem:[%s1030_s1 + $0x10] sm:$0xff]  ;;  %v282_v31 = vld [vmem:[%s1030_s1 + $0x8] sm:$0xff]  ;;  %s599_s25 = sshll.u32 %s824_s22, 6 }
  0x2d   : > { %254 = vadd.xlane.f32.xlu0 %v253_v7  ;;  %v262_v13 = vadd.f32 %v919_v10, %v917_v9  ;;  %v278_v14 = vmax.f32 %v917_v9, %v919_v10  ;;  %v284_v26 = vld [vmem:[%s1030_s1 + $0x18] sm:$0xff]  ;;  %v285_v62 = vld [vmem:[%s1031_s2] sm:$0x1]  ;;  %s503_s13 = scalar_lea.hbm %s1034_s5, %s599_s25 }
  0x2e   : > { %273 = vmax.xlane.f32.xlu2 %v272_v8  ;;  %s506_s16 = sshll.u32 %s503_s13, 4  ;;  %s507_s16 = int_to_ptr.hbm [resolvable:$true] %s506_s16 }
  0x2f   : > { %s714_s26 = sshra.s32 %s507_s16, 4  ;;  %s715_s26 = int_to_ptr.hbm [resolvable:$true] %s714_s26 }
  0x30   : > { %s716_s22 = scalar_lea.hbm %s715_s26, 64  ;;  %p721_p0 = scmp.lt.s32.totalorder %s715_s26, %s1034_s5 }
  0x31   : > { %p717_p6 = scmp.ne.s32.totalorder %s715_s26, %s716_s22  ;;  %p722_p1 = scmp.lt.s32.totalorder %s720_s9, %s716_s22 }
  0x33   : > { %p718_p9 = pnand %p717_p6, %p853_p11  ;;  %p723_p3 = por %p722_p1, %p721_p0 }
  0x34   : > { %270 = vmax.xlane.f32.xlu1 %v269_v11 }
  0x35   : > { %257 = vadd.xlane.f32.xlu0 %v256_v12  ;;  %p719_p13 = pneg %p718_p9 }
  0x36   : > { %263 = vadd.xlane.f32.xlu2 %v262_v13  ;;  %v288_v13 = vld [vmem:[%s1032_s3 + $0x10] sm:$0xff] }
  0x37   : > { %p724_p4 = pnand %p723_p3, %p719_p13 }
  0x3c   : > { %279 = vmax.xlane.f32.xlu1 %v278_v14  ;;  %v286_v14 = vld [vmem:[%s1032_s3] sm:$0xff] }
  0x3d   : > { %276 = vmax.xlane.f32.xlu0 %v275_v15 }
  0x9f   : > { %v261_v16 = vpop.xlane.xlu1 %260 }
  0xa0   : > { %v255_v17 = vpop.xlane.xlu0 %254  ;;  %v267_v19 = vmul.f32 0.00390625, %v261_v16 }
  0xa1   : > { %v274_v18 = vpop.xlane.xlu2 %273  ;;  %v265_v20 = vmul.f32 0.00390625, %v255_v17 }
  0xa2   : > { %v296_v30 = vmul.f32 %v283_v22, %v267_v19  ;;  %v336_v35 = vmul.f32 %v282_v31, %v274_v18 }
  0xa3   : > { %v294_v27 = vmul.f32 %v281_v21, %v265_v20 }
  0xa4   : > { %v302_v38 = vsel %vm298_vm0, %v296_v30, 0.0  ;;  %v340_v46 = vsel %vm298_vm0, %v336_v35, 0.0 }
  0xa5   : > { %v299_v36 = vsel %vm298_vm0, %v294_v27, 0.0 }
  0xa7   : > { %v271_v23 = vpop.xlane.xlu1 %270 }
  0xa8   : > { %v258_v24 = vpop.xlane.xlu0 %257  ;;  %v335_v32 = vmul.f32 %v281_v21, %v271_v23  ;;  %v289_v23 = vld [vmem:[%s1032_s3 + $0x18] sm:$0xff] }
  0xa9   : > { %v264_v25 = vpop.xlane.xlu2 %263  ;;  %v266_v28 = vmul.f32 0.00390625, %v258_v24 }
  0xaa   : > { %v268_v29 = vmul.f32 0.00390625, %v264_v25  ;;  %v339_v40 = vsel %vm298_vm0, %v335_v32, 0.0  ;;  %v287_v25 = vld [vmem:[%s1032_s3 + $0x8] sm:$0xff] }
  0xab   : > { %v295_v33 = vmul.f32 %v282_v31, %v266_v28  ;;  %v341_v48 = vadd.f32 %v340_v46, %v339_v40 }
  0xac   : > { %v297_v34 = vmul.f32 %v284_v26, %v268_v29 }
  0xad   : > { %v300_v37 = vsel %vm298_vm0, %v295_v33, 0.0 }
  0xae   : > { %v301_v39 = vadd.f32 %v300_v37, %v299_v36  ;;  %v304_v41 = vsel %vm298_vm0, %v297_v34, 0.0 }
  0xaf   : > { %v280_v42 = vpop.xlane.xlu1 %279 }
  0xb0   : > { %v303_v43 = vadd.f32 %v302_v38, %v301_v39  ;;  %v277_v44 = vpop.xlane.xlu0 %276  ;;  %v338_v45 = vmul.f32 %v284_v26, %v280_v42  ;;  %v290_v39 = vld [vmem:[%s1033_s4] sm:$0xff] }
  0xb1   : > { %v337_v47 = vmul.f32 %v283_v22, %v277_v44 }
  0xb2   : > { %v305_v49 = vadd.f32 %v304_v41, %v303_v43  ;;  %v344_v51 = vsel %vm298_vm0, %v338_v45, 0.0  ;;  %v770_v43 = vmov 0  }
  0xb3   : > { %v342_v50 = vsel %vm298_vm0, %v337_v47, 0.0  ;;  %651 = vset.pattern.permute.xlu1 %v770_v43  ;;  %652 = vset.pattern.permute.xlu2 %v770_v43  ;;  %v291_v47 = vld [vmem:[%s1033_s4 + $0x8] sm:$0xff] }
  0xb4   : > { %v343_v52 = vadd.f32 %v342_v50, %v341_v48  ;;  %v306_v53 = vrot.slane %v305_v49, 4  ;;  %653 = vset.pattern.permute.xlu0 %v770_v43 }
  0xb6   : > { %v307_v54 = vadd.f32 %v306_v53, %v305_v49  ;;  %v345_v55 = vadd.f32 %v344_v51, %v343_v52  ;;  %v292_v52 = vld [vmem:[%s1033_s4 + $0x10] sm:$0xff] }
  0xb8   : > { %v308_v56 = vrot.slane %v307_v54, 2  ;;  %v346_v57 = vrot.slane %v345_v55, 4 }
  0xba   : > { %v309_v58 = vadd.f32 %v308_v56, %v307_v54  ;;  %v347_v59 = vadd.f32 %v346_v57, %v345_v55 }
  0xbc   : > { %v310_v60 = vrot.slane %v309_v58, 1  ;;  %v348_v61 = vrot.slane %v347_v59, 2 }
  0xbe   : > { %v311_v63 = vadd.f32 %v310_v60, %v309_v58  ;;  %v349_v3 = vadd.f32 %v348_v61, %v347_v59  ;;  %v293_v60 = vld [vmem:[%s1033_s4 + $0x18] sm:$0xff] }
  0xc0   : > { %v350_v7 = vrot.slane %v349_v3, 1  ;;  %v312_v8 = vadd.f32 %v311_v63, %v285_v62 }
  0xc2   : > { %v351_v11 = vadd.f32 %v350_v7, %v349_v3  ;;  %v313_v12 = vmax.f32 %v312_v8, 0.0 }
  0xc4   : > { %v314_v15 = vperm.slane %v313_v12, 0  ;;  %v352_v16 = vadd.f32 %v351_v11, %v285_v62 }
  0xc6   : > { %v317_v17 = vmul.f32 %v314_v15, %v288_v13  ;;  %v315_v18 = vmul.f32 %v314_v15, %v286_v14  ;;  %v353_v19 = vmax.f32 %v352_v16, 0.0  ;;  %v318_v27 = vmul.f32 %v314_v15, %v289_v23 }
  0xc7   : > { %v316_v31 = vmul.f32 %v314_v15, %v287_v25 }
  0xc8   : > { %v325_v20 = vsel %vm298_vm0, %v317_v17, 0.0  ;;  %v319_v21 = vsel %vm298_vm0, %v315_v18, 0.0  ;;  %v354_v22 = vperm.slane %v353_v19, 0  ;;  %v328_v29 = vsel %vm298_vm0, %v318_v27, 0.0 }
  0xc9   : > { %326 = vadd.xlane.f32.xlu1 %v325_v20  ;;  %320 = vadd.xlane.f32.xlu2 %v319_v21  ;;  %v322_v32 = vsel %vm298_vm0, %v316_v31, 0.0 }
  0xca   : > { %v355_v24 = vmul.f32 %v354_v22, %v286_v14  ;;  %v356_v28 = vmul.f32 %v354_v22, %v287_v25  ;;  %v357_v33 = vmul.f32 %v354_v22, %v288_v13  ;;  %v358_v35 = vmul.f32 %v354_v22, %v289_v23 }
  0xcc   : > { %v359_v26 = vsel %vm298_vm0, %v355_v24, 0.0  ;;  %v362_v30 = vsel %vm298_vm0, %v356_v28, 0.0  ;;  %v365_v34 = vsel %vm298_vm0, %v357_v33, 0.0  ;;  %v368_v36 = vsel %vm298_vm0, %v358_v35, 0.0 }
  0xcd   : > { %360 = vadd.xlane.f32.xlu0 %v359_v26 }
  0xd1   : > { %329 = vadd.xlane.f32.xlu2 %v328_v29  ;;  %363 = vadd.xlane.f32.xlu1 %v362_v30 }
  0xd5   : > { %323 = vadd.xlane.f32.xlu0 %v322_v32 }
  0xd9   : > { %366 = vadd.xlane.f32.xlu2 %v365_v34 }
  0xdd   : > { %369 = vadd.xlane.f32.xlu0 %v368_v36 }
 0x13c   : > { %v327_v37 = vpop.xlane.xlu1 %326  ;;  %v321_v38 = vpop.xlane.xlu2 %320 }
 0x13d   : > { %v331_v41 = vadd.f32 %v321_v38, %v290_v39  ;;  %v333_v56 = vadd.f32 %v327_v37, %v292_v52 }
 0x140   : > { %v361_v40 = vpop.xlane.xlu0 %360 }
 0x141   : > { %v371_v42 = vadd.f32 %v361_v40, %v290_v39 }
 0x143   : > { %v375_v44 = vadd.f32 %v371_v42, %v331_v41 }
 0x144   : > { %v330_v45 = vpop.xlane.xlu2 %329  ;;  %v364_v48 = vpop.xlane.xlu1 %363 }
 0x145   : > { %v589_v46 = vmul.f32 -1.442695, %v375_v44  ;;  %v372_v50 = vadd.f32 %v364_v48, %v291_v47  ;;  %v334_v63 = vadd.f32 %v330_v45, %v293_v60 }
 0x147   : > { %654 = vpow2.f32 %v589_v46 }
 0x148   : > { %v324_v49 = vpop.xlane.xlu0 %323 }
 0x149   : > { %v332_v51 = vadd.f32 %v324_v49, %v291_v47 }
 0x14b   : > { %v376_v53 = vadd.f32 %v372_v50, %v332_v51 }
 0x14c   : > { %v367_v54 = vpop.xlane.xlu2 %366 }
 0x14d   : > { %v655_v55 = vpop.eup %654  ;;  %v590_v57 = vmul.f32 -1.442695, %v376_v53  ;;  %v373_v58 = vadd.f32 %v367_v54, %v292_v52 }
 0x14e   : > { %v391_v59 = vadd.f32 1.0, %v655_v55 }
 0x14f   : > { %656 = vpow2.f32 %v590_v57  ;;  %v377_v61 = vadd.f32 %v373_v58, %v333_v56 }
 0x150   : > { %658 = vrcp.f32 %v391_v59  ;;  %v370_v62 = vpop.xlane.xlu0 %369  ;;  %v406_v19 = vand.u32 2147483648, %v391_v59  ;;  %v404_v21 = vand.u32 2147483647, %v391_v59  ;;  %vm400_vm2 = vweird.f32 %v391_v59 }
 0x151   : > { %v591_v3 = vmul.f32 -1.442695, %v377_v61  ;;  %v374_v7 = vadd.f32 %v370_v62, %v293_v60 }
 0x152   : > { %v407_v26 = vor.u32 1.1754944e-38, %v406_v19  ;;  %vm405_vm4 = vcmp.eq.f32.partialorder %v404_v21, 8.507059e+37 }
 0x153   : > { %660 = vpow2.f32 %v591_v3  ;;  %v378_v8 = vadd.f32 %v374_v7, %v334_v63 }
 0x155   : > { %v657_v11 = vpop.eup %656  ;;  %v592_v12 = vmul.f32 -1.442695, %v378_v8 }
 0x156   : > { %v659_v13 = vpop.eup %658  ;;  %v392_v14 = vadd.f32 1.0, %v657_v11 }
 0x157   : > { %662 = vpow2.f32 %v592_v12  ;;  %v396_v15 = vmul.f32 %v659_v13, %v391_v59  ;;  %vm401_vm1 = vweird.f32 %v659_v13 }
 0x158   : > { %664 = vrcp.f32 %v392_v14  ;;  %vm402_vm3 = vmor %vm400_vm2, %vm401_vm1  ;;  %v419_v32 = vand.u32 2147483647, %v392_v14  ;;  %v421_v33 = vand.u32 2147483648, %v392_v14  ;;  %vm415_vm6 = vweird.f32 %v392_v14 }
 0x159   : > { %v661_v16 = vpop.eup %660  ;;  %v397_v17 = vsub.f32 1.0, %v396_v15 }
 0x15a   : > { %v393_v18 = vadd.f32 1.0, %v661_v16  ;;  %vm420_vm8 = vcmp.eq.f32.partialorder %v419_v32, 8.507059e+37  ;;  %v422_v39 = vor.u32 1.1754944e-38, %v421_v33 }
 0x15b   : > { %v398_v20 = vmul.f32 %v659_v13, %v397_v17 }
 0x15c   : > { %666 = vrcp.f32 %v393_v18  ;;  %v434_v40 = vand.u32 2147483647, %v393_v18  ;;  %v436_v41 = vand.u32 2147483648, %v393_v18  ;;  %vm430_vm10 = vweird.f32 %v393_v18 }
 0x15d   : > { %v663_v22 = vpop.eup %662  ;;  %v399_v23 = vadd.f32 %v659_v13, %v398_v20 }
 0x15e   : > { %v665_v24 = vpop.eup %664  ;;  %v394_v25 = vadd.f32 1.0, %v663_v22  ;;  %vm435_vm12 = vcmp.eq.f32.partialorder %v434_v40, 8.507059e+37  ;;  %v437_v48 = vor.u32 1.1754944e-38, %v436_v41 }
 0x15f   : > { %v403_v27 = vsel %vm402_vm3, %v659_v13, %v399_v23  ;;  %v411_v28 = vmul.f32 %v665_v24, %v392_v14  ;;  %vm416_vm5 = vweird.f32 %v665_v24 }
 0x160   : > { %668 = vrcp.f32 %v394_v25  ;;  %v408_v29 = vsel %vm405_vm4, %v407_v26, %v403_v27  ;;  %vm417_vm7 = vmor %vm415_vm6, %vm416_vm5  ;;  %v451_v49 = vand.u32 2147483648, %v394_v25  ;;  %v449_v52 = vand.u32 2147483647, %v394_v25 }
 0x161   : > { %457 = vperm.xlu1 %651, %v408_v29   ;;  %v412_v30 = vsub.f32 1.0, %v411_v28  ;;  %vm445_vm14 = vweird.f32 %v394_v25 }
 0x162   : > { %v667_v31 = vpop.eup %666  ;;  %v452_v55 = vor.u32 1.1754944e-38, %v451_v49  ;;  %vm450_vm0 = vcmp.eq.f32.partialorder %v449_v52, 8.507059e+37 }
 0x163   : > { %v413_v34 = vmul.f32 %v665_v24, %v412_v30  ;;  %v426_v35 = vmul.f32 %v667_v31, %v393_v18  ;;  %vm431_vm9 = vweird.f32 %v667_v31 }
 0x164   : > { %vm432_vm11 = vmor %vm430_vm10, %vm431_vm9 }
 0x165   : > { %v414_v36 = vadd.f32 %v665_v24, %v413_v34  ;;  %v427_v37 = vsub.f32 1.0, %v426_v35 }
 0x166   : > { %v669_v38 = vpop.eup %668 }
 0x167   : > { %v418_v42 = vsel %vm417_vm7, %v665_v24, %v414_v36  ;;  %v428_v43 = vmul.f32 %v667_v31, %v427_v37  ;;  %v441_v44 = vmul.f32 %v669_v38, %v394_v25  ;;  %vm446_vm13 = vweird.f32 %v669_v38 }
 0x168   : > { %v423_v45 = vsel %vm420_vm8, %v422_v39, %v418_v42  ;;  %vm447_vm15 = vmor %vm445_vm14, %vm446_vm13 }
 0x169   : > { %462 = vperm.xlu2 %652, %v423_v45   ;;  %v429_v46 = vadd.f32 %v667_v31, %v428_v43  ;;  %v442_v47 = vsub.f32 1.0, %v441_v44 }
 0x16b   : > { %v433_v50 = vsel %vm432_vm11, %v667_v31, %v429_v46  ;;  %v443_v51 = vmul.f32 %v669_v38, %v442_v47 }
 0x16c   : > { %v438_v53 = vsel %vm435_vm12, %v437_v48, %v433_v50 }
 0x16d   : > { %467 = vperm.xlu0 %653, %v438_v53   ;;  %v444_v54 = vadd.f32 %v669_v38, %v443_v51 }
 0x16f   : > { %v448_v56 = vsel %vm447_vm15, %v669_v38, %v444_v54 }
 0x170   : > { %v453_v57 = vsel %vm450_vm0, %v452_v55, %v448_v56 }
 0x171   : > { %472 = vperm.xlu2 %652, %v453_v57  }
 0x1c3   : > { %v463_v58 = vpop.permute.xlu2 %462 }
 0x1c4   : > { %v477_v59 = vmul.f32 %v463_v58, %v909_v5  ;;  %v478_v60 = vmul.f32 %v463_v58, %v911_v6 }
 0x1c6   : > { %485 = vst [vmem:[%s244_s23 + $0x10] sm:$0xff] %v477_v59 }
 0x1c7   : > { %486 = vst [vmem:[%s244_s23 + $0x18] sm:$0xff] %v478_v60 }
 0x1cb   : > { %v473_v61 = vpop.permute.xlu2 %472 }
 0x1cc   : > { %v481_v62 = vmul.f32 %v473_v61, %v917_v9  ;;  %v482_v63 = vmul.f32 %v473_v61, %v919_v10 }
 0x1ce   : > { %489 = vst [vmem:[%s244_s23 + $0x30] sm:$0xff] %v481_v62 }
 0x1cf   : > { %490 = vst [vmem:[%s244_s23 + $0x38] sm:$0xff] %v482_v63 }
 0x1d3   : > { %v458_v3 = vpop.permute.xlu1 %457 }
 0x1d4   : > { %v475_v7 = vmul.f32 %v458_v3, %v903_v2  ;;  %v476_v8 = vmul.f32 %v458_v3, %v907_v4 }
 0x1d6   : > { %483 = vst [vmem:[%s244_s23] sm:$0xff] %v475_v7 }
 0x1d7   : > { %484 = vst [vmem:[%s244_s23 + $0x8] sm:$0xff] %v476_v8 }
 0x1df   : > { %v468_v5 = vpop.permute.xlu0 %467 }
 0x1e0   : > { %v479_v6 = vmul.f32 %v468_v5, %v899_v0  ;;  %v480_v9 = vmul.f32 %v468_v5, %v901_v1 }
 0x1e2   : > { %487 = vst [vmem:[%s244_s23 + $0x20] sm:$0xff] %v479_v6 }
 0x1e3   : > { %488 = vst [vmem:[%s244_s23 + $0x28] sm:$0xff] %v480_v9 }
 0x1e4   : > { %727 = shalt.err (!%p724_p4)
}
 0x1e5   : > { %s771_s12 = smov 256   ;;  %s772_s11 = smov 16  }
 0x1e6   : > { %602 = dma.vmem_to_hbm [thread:$0]  (%p853_p11), %s505_s15, 1024, %s507_s16, %s492_s17, %s771_s12, %s771_s12, %s772_s11  }
 0x1e7 PF: > { %s521_s23 = sand.u32 1, %s754_s18   ;;  %p1040_p7 = scmp.ge.s32.totalorder %s766_s21, 2 }
 0x1e8   : > { %s522_s25 = scalar_lea.sflag [#allocation4], %s521_s23 }
 0x1e9   : > { %p609_p5 = pnand %p1040_p7, %p857_p12 }
 0x1eb   : > { %p610_p8 = pneg %p609_p5 }
 0x1ed   : > { %749 = dma.done.wait (%p610_p8), %s522_s25, 1024  }
 0x1ee   : > { %751 = vsyncadd (%p610_p8), %s522_s25, 4294966272  ;;  %p18_p10 = scmp.ge.s32.totalorder %s828_s24, 4   ;;  %s1041_s18 = smov %s758_s19 }
 0x1ef   : > { %s1042_s19 = smov %s762_s20  ;;  %s1043_s20 = smov %s840_s27 }
 0x1f0   : > { %s1044_s21 = smov %s828_s24  ;;  %20 = sbr.rel (!%p18_p10) target bundleno = 5 (0x5), region = 85 }
 0x1f5   :  { %528 = vsyncpa [#allocation3], 1 }
 0x1f6   :  { %530 = vsyncpa [#allocation3 + $0x1], 1 }
 0x1f7   :  { %531 = vsyncpa [#allocation4], 1 }
 0x1f8   :  { %533 = vsyncpa [#allocation4 + $0x1], 1 }

</bundles_post_ra>
